<compile_context>
chip_gen: v5e
topology: v5e:2x2
jax: 0.10.0
libtpu: 0.0.40
codegen_flags: <defaults>
</compile_context>

<pallas_src>
import math
import jax
import jax.numpy as jnp
from jax import lax
from jax.experimental import pallas as pl
from jax.experimental.pallas import tpu as pltpu

# ---- small ModelConfig ----
D_MODEL = 32
NUM_HEADS = 4
D_QK = 8          # per-head query/key dim
D_V = 8           # per-head value dim
D_FF = 64
EPS = 1e-6
BATCH = 2
SEQ = 8
# TODO(synk): dropout is treated as identity (inference mode); stochastic dropout omitted.


def _layernorm(x, d):
    # torch LayerNormalization: alpha * (x - mean) / sqrt(std^2 + eps) + bias
    # with std unbiased (N-1), alpha = 1.0, bias = 0.0 (init values).
    mean = jnp.mean(x, axis=-1, keepdims=True)
    diff = x - mean
    var_unbiased = jnp.sum(diff * diff, axis=-1, keepdims=True) * (1.0 / (d - 1))
    return diff * lax.rsqrt(var_unbiased + EPS)     # rsqrt -> EUP


def encoder_block_kernel(x_ref, keep_ref, fill_ref,
                         wq_ref, wk_ref, wv_ref, wo_ref, bo_ref,
                         w1_ref, b1_ref, w2_ref, b2_ref,
                         out_ref):
    x = x_ref[...].astype(jnp.float32)          # (B*S, D)
    keep = keep_ref[...]                        # (B*S, B*S)  1 = attend, 0 = masked/cross-batch
    fill = fill_ref[...]                        # (B*S, B*S)  0 / -1e9 / -3e9 additive fill

    attn = jnp.zeros_like(x)                    # accumulates sum_h head_h @ Wo[h]

    for h in range(NUM_HEADS):                  # static unroll; clean ref loads, no lane slicing
        # Wq already carries the 1/sqrt(d_k) scale (folded wrapper-side).
        qh = jnp.dot(x, wq_ref[h], preferred_element_type=jnp.float32)   # (BS, Dqk)
        kh = jnp.dot(x, wk_ref[h], preferred_element_type=jnp.float32)   # (BS, Dqk)
        vh = jnp.dot(x, wv_ref[h], preferred_element_type=jnp.float32)   # (BS, Dv)

        # scores over the folded row axis; cross-batch entries are killed by keep/fill
        s = lax.dot_general(qh, kh, (((1,), (1,)), ((), ())),
                            preferred_element_type=jnp.float32)          # (BS, BS)
        # exact masked_fill semantics: s*1+0 = s ; s*0+(-1e9) = -1e9 (cross-batch -> -3e9)
        s = s * keep + fill
        s = s - jnp.max(s, axis=-1, keepdims=True)
        p = jnp.exp(s)
        p = p * pl.reciprocal(jnp.sum(p, axis=-1, keepdims=True), approx=True)

        ho = jnp.dot(p, vh, preferred_element_type=jnp.float32)                       # (BS, Dv)
        attn = attn + jnp.dot(ho, wo_ref[h], preferred_element_type=jnp.float32)      # (BS, D)

    attn = attn + bo_ref[...]

    # residual connection 0: x + norm(attention(x))
    x1 = x + _layernorm(attn, D_MODEL)

    # --- feed-forward ---
    h1 = jnp.dot(x1, w1_ref[...], preferred_element_type=jnp.float32) + b1_ref[...]
    h1 = jnp.maximum(h1, 0.0)                                                          # relu
    ff = jnp.dot(h1, w2_ref[...], preferred_element_type=jnp.float32) + b2_ref[...]

    # residual connection 1: x1 + norm(ffn(x1))
    x2 = x1 + _layernorm(ff, D_MODEL)

    out_ref[...] = x2.astype(out_ref.dtype)


def encoder_block(x, mask, params):
    B, S, D = x.shape
    BS = B * S
    wq, wk, wv, wo, bo, w1, b1, w2, b2 = params

    # ---- wrapper-side (XLA) prep: per-head weight stacks, no in-kernel slicing ----
    scale = 1.0 / math.sqrt(D_QK)
    wq_h = (wq * scale).reshape(D, NUM_HEADS, D_QK).transpose(1, 0, 2)   # (H, D, Dqk), scale folded
    wk_h = wk.reshape(D, NUM_HEADS, D_QK).transpose(1, 0, 2)             # (H, D, Dqk)
    wv_h = wv.reshape(D, NUM_HEADS, D_V).transpose(1, 0, 2)              # (H, D, Dv)
    wo_h = wo.reshape(NUM_HEADS, D_V, D)                                 # (H, Dv, D)

    # ---- block-diagonal select/fill mask over the folded (B*S) row axis ----
    # keep: 1 where same batch & mask==1, else 0
    # fill: 0 where keep; -1e9 where same batch & masked (== torch masked_fill);
    #       -3e9 cross-batch so a fully-masked row still normalizes only over its own batch.
    keep_blk = (mask != 0).astype(jnp.float32)                           # (B, S, S)
    fill_blk = jnp.where(mask != 0, 0.0, -1e9).astype(jnp.float32)       # (B, S, S)
    bidx = jnp.arange(B)
    keep4 = jnp.zeros((B, S, B, S), jnp.float32).at[bidx, :, bidx, :].set(keep_blk)
    fill4 = jnp.full((B, S, B, S), -3e9, jnp.float32).at[bidx, :, bidx, :].set(fill_blk)
    keep2d = keep4.reshape(BS, BS)
    fill2d = fill4.reshape(BS, BS)

    x2d = x.reshape(BS, D).astype(jnp.float32)

    vmem = pltpu.MemorySpace.VMEM
    in_specs = [pl.BlockSpec(memory_space=vmem)] * 12
    out_specs = pl.BlockSpec(memory_space=vmem)

    out2d = pl.pallas_call(
        encoder_block_kernel,
        out_shape=jax.ShapeDtypeStruct((BS, D), jnp.float32),
        in_specs=in_specs,
        out_specs=out_specs,
    )(x2d, keep2d, fill2d, wq_h, wk_h, wv_h, wo_h, bo, w1, b1, w2, b2)

    return out2d.reshape(B, S, D)


# ----- pure-JAX reference (for correctness check) -----
def encoder_block_ref(x, mask, params):
    wq, wk, wv, wo, bo, w1, b1, w2, b2 = params
    B, S, D = x.shape

    def layernorm(t):
        mean = jnp.mean(t, axis=-1, keepdims=True)
        diff = t - mean
        var = jnp.sum(diff * diff, axis=-1, keepdims=True) / (D - 1)
        return diff / jnp.sqrt(var + EPS)

    q = (x @ wq).reshape(B, S, NUM_HEADS, D_QK).transpose(0, 2, 1, 3)
    k = (x @ wk).reshape(B, S, NUM_HEADS, D_QK).transpose(0, 2, 1, 3)
    v = (x @ wv).reshape(B, S, NUM_HEADS, D_V).transpose(0, 2, 1, 3)
    s = jnp.einsum("bhqd,bhkd->bhqk", q, k) / math.sqrt(D_QK)
    s = jnp.where(mask[:, None, :, :] == 0, -1e9, s)
    p = jax.nn.softmax(s, axis=-1)
    o = jnp.einsum("bhqk,bhkd->bhqd", p, v).transpose(0, 2, 1, 3).reshape(B, S, NUM_HEADS * D_V)
    attn = o @ wo + bo[0]
    x1 = x + layernorm(attn)
    ff = jnp.maximum(x1 @ w1 + b1[0], 0.0) @ w2 + b2[0]
    return x1 + layernorm(ff)


def make_params(key):
    ks = jax.random.split(key, 9)
    scale = 0.05
    wq = scale * jax.random.normal(ks[0], (D_MODEL, NUM_HEADS * D_QK), jnp.float32)
    wk = scale * jax.random.normal(ks[1], (D_MODEL, NUM_HEADS * D_QK), jnp.float32)
    wv = scale * jax.random.normal(ks[2], (D_MODEL, NUM_HEADS * D_V), jnp.float32)
    wo = scale * jax.random.normal(ks[3], (NUM_HEADS * D_V, D_MODEL), jnp.float32)
    bo = scale * jax.random.normal(ks[4], (1, D_MODEL), jnp.float32)
    w1 = scale * jax.random.normal(ks[5], (D_MODEL, D_FF), jnp.float32)
    b1 = scale * jax.random.normal(ks[6], (1, D_FF), jnp.float32)
    w2 = scale * jax.random.normal(ks[7], (D_FF, D_MODEL), jnp.float32)
    b2 = scale * jax.random.normal(ks[8], (1, D_MODEL), jnp.float32)
    return (wq, wk, wv, wo, bo, w1, b1, w2, b2)


if __name__ == "__main__":
    key = jax.random.PRNGKey(0)
    k_x, k_p = jax.random.split(key)
    x = jax.random.normal(k_x, (BATCH, SEQ, D_MODEL), jnp.float32)

    # src_mask: (B, S, S); 0 => masked.  Second batch element has its last two
    # key positions padded out.
    mask = jnp.ones((BATCH, SEQ, SEQ), jnp.float32)
    mask = mask.at[1, :, SEQ - 2:].set(0.0)

    params = make_params(k_p)

    out = encoder_block(x, mask, params)
    out = jax.block_until_ready(out)

    ref = encoder_block_ref(x, mask, params)
    assert out.shape == (BATCH, SEQ, D_MODEL)
    # Tolerance accounts for the approximate EUP reciprocal in the softmax.
    assert jnp.allclose(out, ref, atol=2e-3, rtol=2e-3), "mismatch vs reference"

    print("KERNEL_OK")
</pallas_src>

<mosaic_0001>
module attributes {stable_mosaic.version = 11 : i64} {
  func.func @encoder_block_kernel(%arg0: memref<16x32xf32, #tpu.memory_space<vmem>>, %arg1: memref<16x16xf32, #tpu.memory_space<vmem>>, %arg2: memref<16x16xf32, #tpu.memory_space<vmem>>, %arg3: memref<4x32x8xf32, #tpu.memory_space<vmem>>, %arg4: memref<4x32x8xf32, #tpu.memory_space<vmem>>, %arg5: memref<4x32x8xf32, #tpu.memory_space<vmem>>, %arg6: memref<4x8x32xf32, #tpu.memory_space<vmem>>, %arg7: memref<1x32xf32, #tpu.memory_space<vmem>>, %arg8: memref<32x64xf32, #tpu.memory_space<vmem>>, %arg9: memref<1x64xf32, #tpu.memory_space<vmem>>, %arg10: memref<64x32xf32, #tpu.memory_space<vmem>>, %arg11: memref<1x32xf32, #tpu.memory_space<vmem>>, %arg12: memref<16x32xf32, #tpu.memory_space<vmem>>) attributes {dimension_semantics = [], scalar_prefetch = 0 : i64, scratch_operands = 0 : i64, tpu.core_type = #tpu.core_type<tc>} {
    %c0 = arith.constant 0 : index
    %c0_0 = arith.constant 0 : index
    %0 = vector.load %arg0[%c0, %c0_0] : memref<16x32xf32, #tpu.memory_space<vmem>>, vector<16x32xf32>
    %c0_1 = arith.constant 0 : index
    %c0_2 = arith.constant 0 : index
    %1 = vector.load %arg1[%c0_1, %c0_2] : memref<16x16xf32, #tpu.memory_space<vmem>>, vector<16x16xf32>
    %c0_3 = arith.constant 0 : index
    %c0_4 = arith.constant 0 : index
    %2 = vector.load %arg2[%c0_3, %c0_4] : memref<16x16xf32, #tpu.memory_space<vmem>>, vector<16x16xf32>
    %cst = arith.constant 0.000000e+00 : f32
    %3 = vector.broadcast %cst : f32 to vector<16x32xf32>
    %c0_5 = arith.constant 0 : index
    %c0_6 = arith.constant 0 : index
    %c0_7 = arith.constant 0 : index
    %4 = vector.load %arg3[%c0_5, %c0_6, %c0_7] : memref<4x32x8xf32, #tpu.memory_space<vmem>>, vector<1x32x8xf32>
    %5 = vector.shape_cast %4 : vector<1x32x8xf32> to vector<32x8xf32>
    %cst_8 = arith.constant dense<0.000000e+00> : vector<16x8xf32>
    %6 = tpu.matmul %0, %5, %cst_8 {dimension_numbers = #tpu.dot_dimension_numbers<[1], [0], [0], [1], [0, 0, 1, 1], [], []>} : vector<16x32xf32>, vector<32x8xf32>, vector<16x8xf32> -> vector<16x8xf32>
    %c0_9 = arith.constant 0 : index
    %c0_10 = arith.constant 0 : index
    %c0_11 = arith.constant 0 : index
    %7 = vector.load %arg4[%c0_9, %c0_10, %c0_11] : memref<4x32x8xf32, #tpu.memory_space<vmem>>, vector<1x32x8xf32>
    %8 = vector.shape_cast %7 : vector<1x32x8xf32> to vector<32x8xf32>
    %cst_12 = arith.constant dense<0.000000e+00> : vector<16x8xf32>
    %9 = tpu.matmul %0, %8, %cst_12 {dimension_numbers = #tpu.dot_dimension_numbers<[1], [0], [0], [1], [0, 0, 1, 1], [], []>} : vector<16x32xf32>, vector<32x8xf32>, vector<16x8xf32> -> vector<16x8xf32>
    %c0_13 = arith.constant 0 : index
    %c0_14 = arith.constant 0 : index
    %c0_15 = arith.constant 0 : index
    %10 = vector.load %arg5[%c0_13, %c0_14, %c0_15] : memref<4x32x8xf32, #tpu.memory_space<vmem>>, vector<1x32x8xf32>
    %11 = vector.shape_cast %10 : vector<1x32x8xf32> to vector<32x8xf32>
    %cst_16 = arith.constant dense<0.000000e+00> : vector<16x8xf32>
    %12 = tpu.matmul %0, %11, %cst_16 {dimension_numbers = #tpu.dot_dimension_numbers<[1], [0], [0], [1], [0, 0, 1, 1], [], []>} : vector<16x32xf32>, vector<32x8xf32>, vector<16x8xf32> -> vector<16x8xf32>
    %cst_17 = arith.constant dense<0.000000e+00> : vector<16x16xf32>
    %13 = tpu.matmul %6, %9, %cst_17 {dimension_numbers = #tpu.dot_dimension_numbers<[1], [1], [0], [0], [0, 0, 1, 0], [], []>} : vector<16x8xf32>, vector<16x8xf32>, vector<16x16xf32> -> vector<16x16xf32>
    %14 = arith.mulf %13, %1 : vector<16x16xf32>
    %15 = arith.addf %14, %2 : vector<16x16xf32>
    %cst_18 = arith.constant dense<0xFF800000> : vector<16xf32>
    %16 = vector.multi_reduction <maximumf>, %15, %cst_18 [1] : vector<16x16xf32> to vector<16xf32>
    %17 = vector.shape_cast %16 : vector<16xf32> to vector<16x1xf32>
    %18 = vector.broadcast %17 : vector<16x1xf32> to vector<16x16xf32>
    %19 = arith.subf %15, %18 : vector<16x16xf32>
    %20 = math.exp %19 : vector<16x16xf32>
    %cst_19 = arith.constant dense<0.000000e+00> : vector<16xf32>
    %21 = vector.multi_reduction <add>, %20, %cst_19 [1] : vector<16x16xf32> to vector<16xf32>
    %22 = vector.shape_cast %21 : vector<16xf32> to vector<16x1xf32>
    %23 = tpu.reciprocal %22 {approx = true} : vector<16x1xf32> -> vector<16x1xf32>
    %24 = vector.broadcast %23 : vector<16x1xf32> to vector<16x16xf32>
    %25 = arith.mulf %20, %24 : vector<16x16xf32>
    %cst_20 = arith.constant dense<0.000000e+00> : vector<16x8xf32>
    %26 = tpu.matmul %25, %12, %cst_20 {dimension_numbers = #tpu.dot_dimension_numbers<[1], [0], [0], [1], [0, 0, 1, 1], [], []>} : vector<16x16xf32>, vector<16x8xf32>, vector<16x8xf32> -> vector<16x8xf32>
    %c0_21 = arith.constant 0 : index
    %c0_22 = arith.constant 0 : index
    %c0_23 = arith.constant 0 : index
    %27 = vector.load %arg6[%c0_21, %c0_22, %c0_23] : memref<4x8x32xf32, #tpu.memory_space<vmem>>, vector<1x8x32xf32>
    %28 = vector.shape_cast %27 : vector<1x8x32xf32> to vector<8x32xf32>
    %cst_24 = arith.constant dense<0.000000e+00> : vector<16x32xf32>
    %29 = tpu.matmul %26, %28, %cst_24 {dimension_numbers = #tpu.dot_dimension_numbers<[1], [0], [0], [1], [0, 0, 1, 1], [], []>} : vector<16x8xf32>, vector<8x32xf32>, vector<16x32xf32> -> vector<16x32xf32>
    %30 = arith.addf %3, %29 : vector<16x32xf32>
    %c1 = arith.constant 1 : index
    %c0_25 = arith.constant 0 : index
    %c0_26 = arith.constant 0 : index
    %31 = vector.load %arg3[%c1, %c0_25, %c0_26] : memref<4x32x8xf32, #tpu.memory_space<vmem>>, vector<1x32x8xf32>
    %32 = vector.shape_cast %31 : vector<1x32x8xf32> to vector<32x8xf32>
    %cst_27 = arith.constant dense<0.000000e+00> : vector<16x8xf32>
    %33 = tpu.matmul %0, %32, %cst_27 {dimension_numbers = #tpu.dot_dimension_numbers<[1], [0], [0], [1], [0, 0, 1, 1], [], []>} : vector<16x32xf32>, vector<32x8xf32>, vector<16x8xf32> -> vector<16x8xf32>
    %c1_28 = arith.constant 1 : index
    %c0_29 = arith.constant 0 : index
    %c0_30 = arith.constant 0 : index
    %34 = vector.load %arg4[%c1_28, %c0_29, %c0_30] : memref<4x32x8xf32, #tpu.memory_space<vmem>>, vector<1x32x8xf32>
    %35 = vector.shape_cast %34 : vector<1x32x8xf32> to vector<32x8xf32>
    %cst_31 = arith.constant dense<0.000000e+00> : vector<16x8xf32>
    %36 = tpu.matmul %0, %35, %cst_31 {dimension_numbers = #tpu.dot_dimension_numbers<[1], [0], [0], [1], [0, 0, 1, 1], [], []>} : vector<16x32xf32>, vector<32x8xf32>, vector<16x8xf32> -> vector<16x8xf32>
    %c1_32 = arith.constant 1 : index
    %c0_33 = arith.constant 0 : index
    %c0_34 = arith.constant 0 : index
    %37 = vector.load %arg5[%c1_32, %c0_33, %c0_34] : memref<4x32x8xf32, #tpu.memory_space<vmem>>, vector<1x32x8xf32>
    %38 = vector.shape_cast %37 : vector<1x32x8xf32> to vector<32x8xf32>
    %cst_35 = arith.constant dense<0.000000e+00> : vector<16x8xf32>
    %39 = tpu.matmul %0, %38, %cst_35 {dimension_numbers = #tpu.dot_dimension_numbers<[1], [0], [0], [1], [0, 0, 1, 1], [], []>} : vector<16x32xf32>, vector<32x8xf32>, vector<16x8xf32> -> vector<16x8xf32>
    %cst_36 = arith.constant dense<0.000000e+00> : vector<16x16xf32>
    %40 = tpu.matmul %33, %36, %cst_36 {dimension_numbers = #tpu.dot_dimension_numbers<[1], [1], [0], [0], [0, 0, 1, 0], [], []>} : vector<16x8xf32>, vector<16x8xf32>, vector<16x16xf32> -> vector<16x16xf32>
    %41 = arith.mulf %40, %1 : vector<16x16xf32>
    %42 = arith.addf %41, %2 : vector<16x16xf32>
    %cst_37 = arith.constant dense<0xFF800000> : vector<16xf32>
    %43 = vector.multi_reduction <maximumf>, %42, %cst_37 [1] : vector<16x16xf32> to vector<16xf32>
    %44 = vector.shape_cast %43 : vector<16xf32> to vector<16x1xf32>
    %45 = vector.broadcast %44 : vector<16x1xf32> to vector<16x16xf32>
    %46 = arith.subf %42, %45 : vector<16x16xf32>
    %47 = math.exp %46 : vector<16x16xf32>
    %cst_38 = arith.constant dense<0.000000e+00> : vector<16xf32>
    %48 = vector.multi_reduction <add>, %47, %cst_38 [1] : vector<16x16xf32> to vector<16xf32>
    %49 = vector.shape_cast %48 : vector<16xf32> to vector<16x1xf32>
    %50 = tpu.reciprocal %49 {approx = true} : vector<16x1xf32> -> vector<16x1xf32>
    %51 = vector.broadcast %50 : vector<16x1xf32> to vector<16x16xf32>
    %52 = arith.mulf %47, %51 : vector<16x16xf32>
    %cst_39 = arith.constant dense<0.000000e+00> : vector<16x8xf32>
    %53 = tpu.matmul %52, %39, %cst_39 {dimension_numbers = #tpu.dot_dimension_numbers<[1], [0], [0], [1], [0, 0, 1, 1], [], []>} : vector<16x16xf32>, vector<16x8xf32>, vector<16x8xf32> -> vector<16x8xf32>
    %c1_40 = arith.constant 1 : index
    %c0_41 = arith.constant 0 : index
    %c0_42 = arith.constant 0 : index
    %54 = vector.load %arg6[%c1_40, %c0_41, %c0_42] : memref<4x8x32xf32, #tpu.memory_space<vmem>>, vector<1x8x32xf32>
    %55 = vector.shape_cast %54 : vector<1x8x32xf32> to vector<8x32xf32>
    %cst_43 = arith.constant dense<0.000000e+00> : vector<16x32xf32>
    %56 = tpu.matmul %53, %55, %cst_43 {dimension_numbers = #tpu.dot_dimension_numbers<[1], [0], [0], [1], [0, 0, 1, 1], [], []>} : vector<16x8xf32>, vector<8x32xf32>, vector<16x32xf32> -> vector<16x32xf32>
    %57 = arith.addf %30, %56 : vector<16x32xf32>
    %c2 = arith.constant 2 : index
    %c0_44 = arith.constant 0 : index
    %c0_45 = arith.constant 0 : index
    %58 = vector.load %arg3[%c2, %c0_44, %c0_45] : memref<4x32x8xf32, #tpu.memory_space<vmem>>, vector<1x32x8xf32>
    %59 = vector.shape_cast %58 : vector<1x32x8xf32> to vector<32x8xf32>
    %cst_46 = arith.constant dense<0.000000e+00> : vector<16x8xf32>
    %60 = tpu.matmul %0, %59, %cst_46 {dimension_numbers = #tpu.dot_dimension_numbers<[1], [0], [0], [1], [0, 0, 1, 1], [], []>} : vector<16x32xf32>, vector<32x8xf32>, vector<16x8xf32> -> vector<16x8xf32>
    %c2_47 = arith.constant 2 : index
    %c0_48 = arith.constant 0 : index
    %c0_49 = arith.constant 0 : index
    %61 = vector.load %arg4[%c2_47, %c0_48, %c0_49] : memref<4x32x8xf32, #tpu.memory_space<vmem>>, vector<1x32x8xf32>
    %62 = vector.shape_cast %61 : vector<1x32x8xf32> to vector<32x8xf32>
    %cst_50 = arith.constant dense<0.000000e+00> : vector<16x8xf32>
    %63 = tpu.matmul %0, %62, %cst_50 {dimension_numbers = #tpu.dot_dimension_numbers<[1], [0], [0], [1], [0, 0, 1, 1], [], []>} : vector<16x32xf32>, vector<32x8xf32>, vector<16x8xf32> -> vector<16x8xf32>
    %c2_51 = arith.constant 2 : index
    %c0_52 = arith.constant 0 : index
    %c0_53 = arith.constant 0 : index
    %64 = vector.load %arg5[%c2_51, %c0_52, %c0_53] : memref<4x32x8xf32, #tpu.memory_space<vmem>>, vector<1x32x8xf32>
    %65 = vector.shape_cast %64 : vector<1x32x8xf32> to vector<32x8xf32>
    %cst_54 = arith.constant dense<0.000000e+00> : vector<16x8xf32>
    %66 = tpu.matmul %0, %65, %cst_54 {dimension_numbers = #tpu.dot_dimension_numbers<[1], [0], [0], [1], [0, 0, 1, 1], [], []>} : vector<16x32xf32>, vector<32x8xf32>, vector<16x8xf32> -> vector<16x8xf32>
    %cst_55 = arith.constant dense<0.000000e+00> : vector<16x16xf32>
    %67 = tpu.matmul %60, %63, %cst_55 {dimension_numbers = #tpu.dot_dimension_numbers<[1], [1], [0], [0], [0, 0, 1, 0], [], []>} : vector<16x8xf32>, vector<16x8xf32>, vector<16x16xf32> -> vector<16x16xf32>
    %68 = arith.mulf %67, %1 : vector<16x16xf32>
    %69 = arith.addf %68, %2 : vector<16x16xf32>
    %cst_56 = arith.constant dense<0xFF800000> : vector<16xf32>
    %70 = vector.multi_reduction <maximumf>, %69, %cst_56 [1] : vector<16x16xf32> to vector<16xf32>
    %71 = vector.shape_cast %70 : vector<16xf32> to vector<16x1xf32>
    %72 = vector.broadcast %71 : vector<16x1xf32> to vector<16x16xf32>
    %73 = arith.subf %69, %72 : vector<16x16xf32>
    %74 = math.exp %73 : vector<16x16xf32>
    %cst_57 = arith.constant dense<0.000000e+00> : vector<16xf32>
    %75 = vector.multi_reduction <add>, %74, %cst_57 [1] : vector<16x16xf32> to vector<16xf32>
    %76 = vector.shape_cast %75 : vector<16xf32> to vector<16x1xf32>
    %77 = tpu.reciprocal %76 {approx = true} : vector<16x1xf32> -> vector<16x1xf32>
    %78 = vector.broadcast %77 : vector<16x1xf32> to vector<16x16xf32>
    %79 = arith.mulf %74, %78 : vector<16x16xf32>
    %cst_58 = arith.constant dense<0.000000e+00> : vector<16x8xf32>
    %80 = tpu.matmul %79, %66, %cst_58 {dimension_numbers = #tpu.dot_dimension_numbers<[1], [0], [0], [1], [0, 0, 1, 1], [], []>} : vector<16x16xf32>, vector<16x8xf32>, vector<16x8xf32> -> vector<16x8xf32>
    %c2_59 = arith.constant 2 : index
    %c0_60 = arith.constant 0 : index
    %c0_61 = arith.constant 0 : index
    %81 = vector.load %arg6[%c2_59, %c0_60, %c0_61] : memref<4x8x32xf32, #tpu.memory_space<vmem>>, vector<1x8x32xf32>
    %82 = vector.shape_cast %81 : vector<1x8x32xf32> to vector<8x32xf32>
    %cst_62 = arith.constant dense<0.000000e+00> : vector<16x32xf32>
    %83 = tpu.matmul %80, %82, %cst_62 {dimension_numbers = #tpu.dot_dimension_numbers<[1], [0], [0], [1], [0, 0, 1, 1], [], []>} : vector<16x8xf32>, vector<8x32xf32>, vector<16x32xf32> -> vector<16x32xf32>
    %84 = arith.addf %57, %83 : vector<16x32xf32>
    %c3 = arith.constant 3 : index
    %c0_63 = arith.constant 0 : index
    %c0_64 = arith.constant 0 : index
    %85 = vector.load %arg3[%c3, %c0_63, %c0_64] : memref<4x32x8xf32, #tpu.memory_space<vmem>>, vector<1x32x8xf32>
    %86 = vector.shape_cast %85 : vector<1x32x8xf32> to vector<32x8xf32>
    %cst_65 = arith.constant dense<0.000000e+00> : vector<16x8xf32>
    %87 = tpu.matmul %0, %86, %cst_65 {dimension_numbers = #tpu.dot_dimension_numbers<[1], [0], [0], [1], [0, 0, 1, 1], [], []>} : vector<16x32xf32>, vector<32x8xf32>, vector<16x8xf32> -> vector<16x8xf32>
    %c3_66 = arith.constant 3 : index
    %c0_67 = arith.constant 0 : index
    %c0_68 = arith.constant 0 : index
    %88 = vector.load %arg4[%c3_66, %c0_67, %c0_68] : memref<4x32x8xf32, #tpu.memory_space<vmem>>, vector<1x32x8xf32>
    %89 = vector.shape_cast %88 : vector<1x32x8xf32> to vector<32x8xf32>
    %cst_69 = arith.constant dense<0.000000e+00> : vector<16x8xf32>
    %90 = tpu.matmul %0, %89, %cst_69 {dimension_numbers = #tpu.dot_dimension_numbers<[1], [0], [0], [1], [0, 0, 1, 1], [], []>} : vector<16x32xf32>, vector<32x8xf32>, vector<16x8xf32> -> vector<16x8xf32>
    %c3_70 = arith.constant 3 : index
    %c0_71 = arith.constant 0 : index
    %c0_72 = arith.constant 0 : index
    %91 = vector.load %arg5[%c3_70, %c0_71, %c0_72] : memref<4x32x8xf32, #tpu.memory_space<vmem>>, vector<1x32x8xf32>
    %92 = vector.shape_cast %91 : vector<1x32x8xf32> to vector<32x8xf32>
    %cst_73 = arith.constant dense<0.000000e+00> : vector<16x8xf32>
    %93 = tpu.matmul %0, %92, %cst_73 {dimension_numbers = #tpu.dot_dimension_numbers<[1], [0], [0], [1], [0, 0, 1, 1], [], []>} : vector<16x32xf32>, vector<32x8xf32>, vector<16x8xf32> -> vector<16x8xf32>
    %cst_74 = arith.constant dense<0.000000e+00> : vector<16x16xf32>
    %94 = tpu.matmul %87, %90, %cst_74 {dimension_numbers = #tpu.dot_dimension_numbers<[1], [1], [0], [0], [0, 0, 1, 0], [], []>} : vector<16x8xf32>, vector<16x8xf32>, vector<16x16xf32> -> vector<16x16xf32>
    %95 = arith.mulf %94, %1 : vector<16x16xf32>
    %96 = arith.addf %95, %2 : vector<16x16xf32>
    %cst_75 = arith.constant dense<0xFF800000> : vector<16xf32>
    %97 = vector.multi_reduction <maximumf>, %96, %cst_75 [1] : vector<16x16xf32> to vector<16xf32>
    %98 = vector.shape_cast %97 : vector<16xf32> to vector<16x1xf32>
    %99 = vector.broadcast %98 : vector<16x1xf32> to vector<16x16xf32>
    %100 = arith.subf %96, %99 : vector<16x16xf32>
    %101 = math.exp %100 : vector<16x16xf32>
    %cst_76 = arith.constant dense<0.000000e+00> : vector<16xf32>
    %102 = vector.multi_reduction <add>, %101, %cst_76 [1] : vector<16x16xf32> to vector<16xf32>
    %103 = vector.shape_cast %102 : vector<16xf32> to vector<16x1xf32>
    %104 = tpu.reciprocal %103 {approx = true} : vector<16x1xf32> -> vector<16x1xf32>
    %105 = vector.broadcast %104 : vector<16x1xf32> to vector<16x16xf32>
    %106 = arith.mulf %101, %105 : vector<16x16xf32>
    %cst_77 = arith.constant dense<0.000000e+00> : vector<16x8xf32>
    %107 = tpu.matmul %106, %93, %cst_77 {dimension_numbers = #tpu.dot_dimension_numbers<[1], [0], [0], [1], [0, 0, 1, 1], [], []>} : vector<16x16xf32>, vector<16x8xf32>, vector<16x8xf32> -> vector<16x8xf32>
    %c3_78 = arith.constant 3 : index
    %c0_79 = arith.constant 0 : index
    %c0_80 = arith.constant 0 : index
    %108 = vector.load %arg6[%c3_78, %c0_79, %c0_80] : memref<4x8x32xf32, #tpu.memory_space<vmem>>, vector<1x8x32xf32>
    %109 = vector.shape_cast %108 : vector<1x8x32xf32> to vector<8x32xf32>
    %cst_81 = arith.constant dense<0.000000e+00> : vector<16x32xf32>
    %110 = tpu.matmul %107, %109, %cst_81 {dimension_numbers = #tpu.dot_dimension_numbers<[1], [0], [0], [1], [0, 0, 1, 1], [], []>} : vector<16x8xf32>, vector<8x32xf32>, vector<16x32xf32> -> vector<16x32xf32>
    %111 = arith.addf %84, %110 : vector<16x32xf32>
    %c0_82 = arith.constant 0 : index
    %c0_83 = arith.constant 0 : index
    %112 = vector.load %arg7[%c0_82, %c0_83] : memref<1x32xf32, #tpu.memory_space<vmem>>, vector<1x32xf32>
    %113 = vector.broadcast %112 : vector<1x32xf32> to vector<16x32xf32>
    %114 = arith.addf %111, %113 : vector<16x32xf32>
    %cst_84 = arith.constant dense<0.000000e+00> : vector<16xf32>
    %115 = vector.multi_reduction <add>, %114, %cst_84 [1] : vector<16x32xf32> to vector<16xf32>
    %116 = vector.shape_cast %115 : vector<16xf32> to vector<16x1xf32>
    %cst_85 = arith.constant 3.200000e+01 : f32
    %117 = vector.broadcast %cst_85 : f32 to vector<16x1xf32>
    %118 = arith.divf %116, %117 : vector<16x1xf32>
    %119 = vector.broadcast %118 : vector<16x1xf32> to vector<16x32xf32>
    %120 = arith.subf %114, %119 : vector<16x32xf32>
    %121 = arith.mulf %120, %120 : vector<16x32xf32>
    %cst_86 = arith.constant dense<0.000000e+00> : vector<16xf32>
    %122 = vector.multi_reduction <add>, %121, %cst_86 [1] : vector<16x32xf32> to vector<16xf32>
    %123 = vector.shape_cast %122 : vector<16xf32> to vector<16x1xf32>
    %cst_87 = arith.constant 0.0322580636 : f32
    %124 = vector.broadcast %cst_87 : f32 to vector<16x1xf32>
    %125 = arith.mulf %123, %124 : vector<16x1xf32>
    %cst_88 = arith.constant 9.99999997E-7 : f32
    %126 = vector.broadcast %cst_88 : f32 to vector<16x1xf32>
    %127 = arith.addf %125, %126 : vector<16x1xf32>
    %128 = math.rsqrt %127 : vector<16x1xf32>
    %129 = vector.broadcast %128 : vector<16x1xf32> to vector<16x32xf32>
    %130 = arith.mulf %120, %129 : vector<16x32xf32>
    %131 = arith.addf %0, %130 : vector<16x32xf32>
    %c0_89 = arith.constant 0 : index
    %c0_90 = arith.constant 0 : index
    %132 = vector.load %arg8[%c0_89, %c0_90] : memref<32x64xf32, #tpu.memory_space<vmem>>, vector<32x64xf32>
    %cst_91 = arith.constant dense<0.000000e+00> : vector<16x64xf32>
    %133 = tpu.matmul %131, %132, %cst_91 {dimension_numbers = #tpu.dot_dimension_numbers<[1], [0], [0], [1], [0, 0, 1, 1], [], []>} : vector<16x32xf32>, vector<32x64xf32>, vector<16x64xf32> -> vector<16x64xf32>
    %c0_92 = arith.constant 0 : index
    %c0_93 = arith.constant 0 : index
    %134 = vector.load %arg9[%c0_92, %c0_93] : memref<1x64xf32, #tpu.memory_space<vmem>>, vector<1x64xf32>
    %135 = vector.broadcast %134 : vector<1x64xf32> to vector<16x64xf32>
    %136 = arith.addf %133, %135 : vector<16x64xf32>
    %cst_94 = arith.constant 0.000000e+00 : f32
    %137 = vector.broadcast %cst_94 : f32 to vector<16x64xf32>
    %138 = arith.maximumf %136, %137 : vector<16x64xf32>
    %c0_95 = arith.constant 0 : index
    %c0_96 = arith.constant 0 : index
    %139 = vector.load %arg10[%c0_95, %c0_96] : memref<64x32xf32, #tpu.memory_space<vmem>>, vector<64x32xf32>
    %cst_97 = arith.constant dense<0.000000e+00> : vector<16x32xf32>
    %140 = tpu.matmul %138, %139, %cst_97 {dimension_numbers = #tpu.dot_dimension_numbers<[1], [0], [0], [1], [0, 0, 1, 1], [], []>} : vector<16x64xf32>, vector<64x32xf32>, vector<16x32xf32> -> vector<16x32xf32>
    %c0_98 = arith.constant 0 : index
    %c0_99 = arith.constant 0 : index
    %141 = vector.load %arg11[%c0_98, %c0_99] : memref<1x32xf32, #tpu.memory_space<vmem>>, vector<1x32xf32>
    %142 = vector.broadcast %141 : vector<1x32xf32> to vector<16x32xf32>
    %143 = arith.addf %140, %142 : vector<16x32xf32>
    %cst_100 = arith.constant dense<0.000000e+00> : vector<16xf32>
    %144 = vector.multi_reduction <add>, %143, %cst_100 [1] : vector<16x32xf32> to vector<16xf32>
    %145 = vector.shape_cast %144 : vector<16xf32> to vector<16x1xf32>
    %cst_101 = arith.constant 3.200000e+01 : f32
    %146 = vector.broadcast %cst_101 : f32 to vector<16x1xf32>
    %147 = arith.divf %145, %146 : vector<16x1xf32>
    %148 = vector.broadcast %147 : vector<16x1xf32> to vector<16x32xf32>
    %149 = arith.subf %143, %148 : vector<16x32xf32>
    %150 = arith.mulf %149, %149 : vector<16x32xf32>
    %cst_102 = arith.constant dense<0.000000e+00> : vector<16xf32>
    %151 = vector.multi_reduction <add>, %150, %cst_102 [1] : vector<16x32xf32> to vector<16xf32>
    %152 = vector.shape_cast %151 : vector<16xf32> to vector<16x1xf32>
    %cst_103 = arith.constant 0.0322580636 : f32
    %153 = vector.broadcast %cst_103 : f32 to vector<16x1xf32>
    %154 = arith.mulf %152, %153 : vector<16x1xf32>
    %cst_104 = arith.constant 9.99999997E-7 : f32
    %155 = vector.broadcast %cst_104 : f32 to vector<16x1xf32>
    %156 = arith.addf %154, %155 : vector<16x1xf32>
    %157 = math.rsqrt %156 : vector<16x1xf32>
    %158 = vector.broadcast %157 : vector<16x1xf32> to vector<16x32xf32>
    %159 = arith.mulf %149, %158 : vector<16x32xf32>
    %160 = arith.addf %131, %159 : vector<16x32xf32>
    %c0_105 = arith.constant 0 : index
    %c0_106 = arith.constant 0 : index
    %161 = vector.load %arg12[%c0_105, %c0_106] : memref<16x32xf32, #tpu.memory_space<vmem>>, vector<16x32xf32>
    tpu.vector_store %arg12[%c0_105, %c0_106], %160 {strides = array<i32>} : memref<16x32xf32, #tpu.memory_space<vmem>>, vector<16x32xf32>,
    return
  }
}

</mosaic_0001>

<bundles_post_ra>
// kernel: tpu_custom_call.1
= control target key start
LH: loop header
LB: loop body
LE: loop exit
PB: predicated region body
PF: predicated region fallthrough
CT: control target
= control target key end

     0   :  { %s1720_s0 = inlined_call_operand.vmem [shape: f32[16,32], index: 0, kind: input, shape index: {}]   ;;  %s1721_s1 = inlined_call_operand.vmem [shape: f32[16,16], index: 1, kind: input, shape index: {}]   ;;  %s1722_s2 = inlined_call_operand.vmem [shape: f32[16,16], index: 2, kind: input, shape index: {}]   ;;  %s1723_s3 = inlined_call_operand.vmem [shape: f32[4,32,8], index: 3, kind: input, shape index: {}]   ;;  %s1724_s4 = inlined_call_operand.vmem [shape: f32[4,32,8], index: 4, kind: input, shape index: {}]   ;;  %s1725_s5 = inlined_call_operand.vmem [shape: f32[4,32,8], index: 5, kind: input, shape index: {}]   ;;  %s1726_s6 = inlined_call_operand.vmem [shape: f32[4,8,32], index: 6, kind: input, shape index: {}]   ;;  %s1727_s7 = inlined_call_operand.vmem [shape: f32[1,32], index: 7, kind: input, shape index: {}]   ;;  %s1728_s8 = inlined_call_operand.vmem [shape: f32[32,64], index: 8, kind: input, shape index: {}]   ;;  %s1729_s9 = inlined_call_operand.vmem [shape: f32[1,64], index: 9, kind: input, shape index: {}]   ;;  %s1730_s10 = inlined_call_operand.vmem [shape: f32[64,32], index: 10, kind: input, shape index: {}]   ;;  %s1731_s11 = inlined_call_operand.vmem [shape: f32[1,32], index: 11, kind: input, shape index: {}]   ;;  %s1732_s12 = inlined_call_operand.hbm [shape: f32[16,32], index: 12, kind: output, shape index: {}]  }
   0x1   :  { %v85_v0 = vld [vmem:[%s1724_s4 + $0x18] sm:$0xff]  ;;  %v84_v1 = vld [vmem:[%s1724_s4 + $0x10] sm:$0xff]  ;;  %v83_v3 = vld [vmem:[%s1724_s4 + $0x8] sm:$0xff] }
   0x2   :  { %1186 = vmatpush.msra.mxu3 %v85_v0  ;;  %98 = vmatpush.msra.mxu1 %v85_v0  ;;  %v51_v2 = vld [vmem:[%s1723_s3 + $0x18] sm:$0xff]  ;;  %v50_v4 = vld [vmem:[%s1723_s3 + $0x10] sm:$0xff]  ;;  %v49_v5 = vld [vmem:[%s1723_s3 + $0x8] sm:$0xff] }
   0x3   :  { %71 = vmatpush.msra.mxu0 %v51_v2  ;;  %1182 = vmatpush.msra.mxu2 %v51_v2  ;;  %v82_v6 = vld [vmem:[%s1724_s4] sm:$0xff] }
   0x4   :  { %1187 = vmatpush.msra.mxu3 %v84_v1  ;;  %99 = vmatpush.msra.mxu1 %v84_v1 }
   0x5   :  { %72 = vmatpush.msra.mxu0 %v50_v4  ;;  %1183 = vmatpush.msra.mxu2 %v50_v4 }
   0x6   :  { %17 = vsyncpa [#allocation3], 0  ;;  %1188 = vmatpush.msra.mxu3 %v83_v3  ;;  %v1358_v7 = vld [vmem:[%s1720_s0 + $0x8] sm:$0xff]  ;;  %vm52_vm0 = vcmask 261120   ;;  %100 = vmatpush.msra.mxu1 %v83_v3  ;;  %v1363_v8 = vld [vmem:[%s1720_s0] sm:$0xff]  ;;  %vm136_vm1 = vcmask 64512  }
   0x7   :  { %73 = vmatpush.msra.mxu0 %v49_v5  ;;  %1184 = vmatpush.msra.mxu2 %v49_v5  ;;  %v48_v9 = vld [vmem:[%s1723_s3] sm:$0xff]  ;;  %v112_v14 = vld [vmem:[%s1725_s5 + $0x18] sm:$0xff]  ;;  %v111_v15 = vld [vmem:[%s1725_s5 + $0x10] sm:$0xff]  ;;  %vm176_vm2 = vcmask 130048   ;;  %vm987_vm10 = vcmask 523264   ;;  %s1071_s15 = sshll.u32 %s1732_s12, 4  ;;  %s1072_s15 = int_to_ptr.hbm [resolvable:$true] %s1071_s15 }
   0x8   :  { %1189 = vmatpush.msra.mxu3 %v82_v6  ;;  %101 = vmatpush.msra.mxu1 %v82_v6  ;;  %v110_v16 = vld [vmem:[%s1725_s5 + $0x8] sm:$0xff]  ;;  %v109_v17 = vld [vmem:[%s1725_s5] sm:$0xff]  ;;  %v1104_v18 = vld [vmem:[%s1724_s4 + $0x38] sm:$0xff]  ;;  %s1267_s16 = smov 128  }
   0x9   :  { %1086 = vmatmul.msk.f32.vlgmr.msra.gmra.mxu3 %vm52_vm0, %v1358_v7  ;;  %1085 = vmatmul.msk.f32.vlgmr.msra.gmra.mxu1 %vm52_vm0, %v1363_v8  ;;  %v1103_v19 = vld [vmem:[%s1724_s4 + $0x30] sm:$0xff]  ;;  %v1102_v20 = vld [vmem:[%s1724_s4 + $0x28] sm:$0xff]  ;;  %v1101_v21 = vld [vmem:[%s1724_s4 + $0x20] sm:$0xff] }
   0xa   :  { %74 = vmatpush.msra.mxu0 %v48_v9  ;;  %1185 = vmatpush.msra.mxu2 %v48_v9  ;;  %v1409_v22 = vld [vmem:[%s1721_s1] sm:$0xff]  ;;  %v1424_v28 = vld [vmem:[%s1721_s1 + $0x8] sm:$0xff]  ;;  %v1098_v34 = vld [vmem:[%s1723_s3 + $0x38] sm:$0xff] }
   0xb   :  { %1083 = vmatmul.msk.f32.vlgmr.msra.gmra.mxu0 %vm52_vm0, %v1363_v8  ;;  %1084 = vmatmul.msk.f32.vlgmr.msra.gmra.mxu2 %vm52_vm0, %v1358_v7  ;;  %v1416_v24 = vld [vmem:[%s1722_s2] sm:$0xff]  ;;  %v1431_v30 = vld [vmem:[%s1722_s2 + $0x8] sm:$0xff]  ;;  %v1097_v35 = vld [vmem:[%s1723_s3 + $0x30] sm:$0xff] }
   0xc   :  { %125 = vmatpush.msrb.mxu2 %v112_v14  ;;  %246 = vmatpush.msrb.mxu1 %v1098_v34  ;;  %v1096_v36 = vld [vmem:[%s1723_s3 + $0x28] sm:$0xff]  ;;  %v1095_v37 = vld [vmem:[%s1723_s3 + $0x20] sm:$0xff]  ;;  %v1110_v53 = vld [vmem:[%s1725_s5 + $0x38] sm:$0xff] }
   0xd   :  { %v1109_v54 = vld [vmem:[%s1725_s5 + $0x30] sm:$0xff]  ;;  %v1108_v55 = vld [vmem:[%s1725_s5 + $0x28] sm:$0xff]  ;;  %v1107_v56 = vld [vmem:[%s1725_s5 + $0x20] sm:$0xff] }
   0xe   :  { %126 = vmatpush.msrb.mxu2 %v111_v15  ;;  %247 = vmatpush.msrb.mxu1 %v1097_v35  ;;  %v228_v0 = vld [vmem:[%s1726_s6] sm:$0xff]  ;;  %v1126_v35 = vld [vmem:[%s1723_s3 + $0x50] sm:$0xff] }
  0x10   :  { %127 = vmatpush.msrb.mxu2 %v110_v16  ;;  %248 = vmatpush.msrb.mxu1 %v1096_v36  ;;  %v1125_v36 = vld [vmem:[%s1723_s3 + $0x48] sm:$0xff] }
  0x12   :  { %128 = vmatpush.msrb.mxu2 %v109_v17  ;;  %249 = vmatpush.msrb.mxu1 %v1095_v37  ;;  %v1124_v37 = vld [vmem:[%s1723_s3 + $0x40] sm:$0xff] }
  0x13   :  { %1087 = vmatmul.msk.f32.vlgmr.msrb.gmra.mxu2 %vm52_vm0, %v1363_v8  ;;  %1099 = vmatmul.msk.f32.vlgmr.msrb.gmra.mxu1 %vm52_vm0, %v1363_v8 }
  0x14   :  { %274 = vmatpush.msra.mxu2 %v1104_v18 }
  0x16   :  { %275 = vmatpush.msra.mxu2 %v1103_v19 }
  0x18   :  { %276 = vmatpush.msra.mxu2 %v1102_v20 }
  0x1a   :  { %277 = vmatpush.msra.mxu2 %v1101_v21 }
  0x1b   :  { %1088 = vmatmul.msk.f32.gmra.mxu2 %vm52_vm0, %v1358_v7  ;;  %1100 = vmatmul.msk.f32.gmra.mxu1 %vm52_vm0, %v1358_v7 }
  0x23   :  { %1105 = vmatmul.msk.f32.vlgmr.msra.gmra.mxu2 %vm52_vm0, %v1363_v8 }
  0x2b   :  { %1106 = vmatmul.msk.f32.gmra.mxu2 %vm52_vm0, %v1358_v7 }
  0x86   :  { %v103_v11 = vpop.f32.mrf.mxu1 }
  0x88   :  { %v76_v12 = vpop.f32.mrf.mxu0 }
  0x8c   :  { %v106_v10 = vpop.f32.mrf.mxu3 }
  0x8d   :  { %1089 = vmatpush.xpose.msk.msrb.mxu3 %vm136_vm1, %v106_v10 }
  0x8e   :  { %v79_v13 = vpop.f32.mrf.mxu2 }
  0x90   :  { %v251_v62 = vpop.f32.mrf.mxu1 }
  0x91   :  { %1090 = vmatpush.xpose.msk.msrb.mxu3 %vm136_vm1, %v103_v11 }
  0x94   :  { %1091 = vmatmul.msk.f32.vlgmr.msrb.gmra.mxu3 %vm136_vm1, %v76_v12 }
  0x95   :  { %302 = vmatpush.msra.mxu3 %v1110_v53  ;;  %v1137_v53 = vld [vmem:[%s1725_s5 + $0x48] sm:$0xff] }
  0x96   :  { %v130_v39 = vpop.f32.mrf.mxu2 }
  0x97   :  { %303 = vmatpush.msra.mxu3 %v1109_v54  ;;  %v1136_v54 = vld [vmem:[%s1725_s5 + $0x40] sm:$0xff] }
  0x98   :  { %v254_v63 = vpop.f32.mrf.mxu1 }
  0x99   :  { %304 = vmatpush.msra.mxu3 %v1108_v55 }
  0x9b   :  { %305 = vmatpush.msra.mxu3 %v1107_v56 }
  0x9c   :  { %1092 = vmatmul.msk.f32.gmra.mxu3 %vm136_vm1, %v79_v13 }
  0x9d   :  { %455 = vmatpush.msrb.mxu3 %v228_v0 }
  0x9e   :  { %v133_v43 = vpop.f32.mrf.mxu2 }
  0x9f   :  { %219 = vmatpush.msrb.mxu0 %v133_v43  ;;  %v1119_v43 = vld [vmem:[%s1726_s6 + $0x8] sm:$0xff] }
  0xa0   :  { %426 = vmatpush.msrb.mxu2 %v1119_v43 }
  0xa1   :  { %220 = vmatpush.msrb.mxu0 %v130_v39 }
  0xa4   :  { %1111 = vmatmul.msk.f32.vlgmr.msra.gmra.mxu3 %vm52_vm0, %v1363_v8 }
  0xa6   :  { %v279_v50 = vpop.f32.mrf.mxu2 }
  0xac   :  { %1112 = vmatmul.msk.f32.gmra.mxu3 %vm52_vm0, %v1358_v7 }
  0xae   :  { %v282_v51 = vpop.f32.mrf.mxu2 }
  0xaf   :  { %1113 = vmatpush.xpose.msk.msra.mxu0 %vm136_vm1, %v282_v51  ;;  %v1139_v51 = vld [vmem:[%s1725_s5 + $0x58] sm:$0xff] }
  0xb0   :  { %536 = vmatpush.msra.mxu2 %v1139_v51 }
  0xb3   :  { %1114 = vmatpush.xpose.msk.msra.mxu0 %vm136_vm1, %v279_v50 }
 0x117   :  { %v166_v23 = vpop.f32.mrf.mxu3 }
 0x118   :  { %v172_v25 = vmul.f32 %v166_v23, %v1409_v22 }
 0x11a   :  { %v174_v26 = vadd.f32 %v172_v25, %v1416_v24 }
 0x11c   :  { %v177_v27 = vsel %vm176_vm2, %v174_v26, -inf }
 0x11d   :  { %178 = vmax.xlane.f32.xlu0 %v177_v27  ;;  %v1133_v27 = vld [vmem:[%s1724_s4 + $0x58] sm:$0xff] }
 0x11f   :  { %v169_v29 = vpop.f32.mrf.mxu3 }
 0x120   :  { %v173_v31 = vmul.f32 %v169_v29, %v1424_v28  ;;  %v1132_v29 = vld [vmem:[%s1724_s4 + $0x50] sm:$0xff] }
 0x122   :  { %v175_v32 = vadd.f32 %v173_v31, %v1431_v30  ;;  %v1131_v31 = vld [vmem:[%s1724_s4 + $0x48] sm:$0xff] }
 0x124   :  { %v180_v33 = vsel %vm176_vm2, %v175_v32, -inf }
 0x125   :  { %181 = vmax.xlane.f32.xlu0 %v180_v33  ;;  %v1127_v33 = vld [vmem:[%s1723_s3 + $0x58] sm:$0xff] }
 0x127   :  { %v307_v2 = vpop.f32.mrf.mxu3 }
 0x12f   :  { %v310_v4 = vpop.f32.mrf.mxu3 }
 0x130   :  { %394 = vmatpush.msra.mxu1 %v310_v4 }
 0x132   :  { %395 = vmatpush.msra.mxu1 %v307_v2  ;;  %v1159_v2 = vld [vmem:[%s1724_s4 + $0x70] sm:$0xff] }
 0x134   :  { %508 = vmatpush.msrb.mxu1 %v1133_v27 }
 0x136   :  { %509 = vmatpush.msrb.mxu1 %v1132_v29 }
 0x138   :  { %510 = vmatpush.msrb.mxu1 %v1131_v31 }
 0x190   :  { %v179_v38 = vpop.xlane.xlu0 %178 }
 0x191   :  { %v183_v40 = vsub.f32 %v174_v26, %v179_v38 }
 0x193   :  { %v185_v41 = vmul.f32 1.442695, %v183_v40 }
 0x195   :  { %1197 = vpow2.f32 %v185_v41 }
 0x198   :  { %v182_v42 = vpop.xlane.xlu0 %181 }
 0x199   :  { %v184_v44 = vsub.f32 %v175_v32, %v182_v42  ;;  %v1130_v32 = vld [vmem:[%s1724_s4 + $0x40] sm:$0xff] }
 0x19a   :  { %511 = vmatpush.msrb.mxu1 %v1130_v32 }
 0x19b   :  { %v1198_v45 = vpop.eup %1197  ;;  %v187_v46 = vmul.f32 1.442695, %v184_v44 }
 0x19c   :  { %v189_v47 = vsel %vm176_vm2, %v1198_v45, 0.0 }
 0x19d   :  { %1199 = vpow2.f32 %v187_v46  ;;  %190 = vadd.xlane.f32.xlu1 %v189_v47 }
 0x1a3   :  { %v1200_v48 = vpop.eup %1199 }
 0x1a4   :  { %v192_v49 = vsel %vm176_vm2, %v1200_v48, 0.0 }
 0x1a5   :  { %193 = vadd.xlane.f32.xlu1 %v192_v49 }
 0x210   :  { %v191_v52 = vpop.xlane.xlu1 %190 }
 0x211   :  { %1201 = vrcp.f32 %v191_v52  ;;  %v1138_v52 = vld [vmem:[%s1725_s5 + $0x50] sm:$0xff] }
 0x212   :  { %537 = vmatpush.msra.mxu2 %v1138_v52 }
 0x214   :  { %538 = vmatpush.msra.mxu2 %v1137_v53 }
 0x216   :  { %539 = vmatpush.msra.mxu2 %v1136_v54 }
 0x217   :  { %v1202_v57 = vpop.eup %1201 }
 0x218   :  { %v194_v58 = vpop.xlane.xlu1 %193  ;;  %v197_v59 = vmul.f32 %v1202_v57, %v1198_v45 }
 0x219   :  { %1203 = vrcp.f32 %v194_v58 }
 0x21a   :  { %1093 = vmatmul.msk.f32.vlgmr.msrb.gmra.mxu0 %vm176_vm2, %v197_v59 }
 0x21b   :  { %480 = vmatpush.msrb.mxu0 %v1127_v33 }
 0x21d   :  { %481 = vmatpush.msrb.mxu0 %v1126_v35 }
 0x21f   :  { %v1204_v60 = vpop.eup %1203  ;;  %482 = vmatpush.msrb.mxu0 %v1125_v36 }
 0x220   :  { %v198_v61 = vmul.f32 %v1204_v60, %v1200_v48 }
 0x221   :  { %483 = vmatpush.msrb.mxu0 %v1124_v37 }
 0x222   :  { %1094 = vmatmul.msk.f32.gmra.mxu0 %vm176_vm2, %v198_v61 }
 0x22a   :  { %1115 = vmatmul.msk.f32.vlgmr.msra.gmra.mxu0 %vm136_vm1, %v251_v62 }
 0x232   :  { %1116 = vmatmul.msk.f32.gmra.mxu0 %vm136_vm1, %v254_v63 }
 0x23a   :  { %1128 = vmatmul.msk.f32.vlgmr.msrb.gmra.mxu0 %vm52_vm0, %v1363_v8 }
 0x242   :  { %1129 = vmatmul.msk.f32.gmra.mxu0 %vm52_vm0, %v1358_v7 }
 0x297   :  { %v222_v1 = vpop.f32.mrf.mxu0 }
 0x298   :  { %1122 = vmatmul.msk.f32.vlgmr.msrb.gmra.mxu3 %vm136_vm1, %v222_v1  ;;  %v1160_v1 = vld [vmem:[%s1724_s4 + $0x78] sm:$0xff] }
 0x29f   :  { %v225_v3 = vpop.f32.mrf.mxu0 }
 0x2a0   :  { %1123 = vmatmul.msk.f32.gmra.mxu3 %vm136_vm1, %v225_v3  ;;  %v1158_v3 = vld [vmem:[%s1724_s4 + $0x68] sm:$0xff] }
 0x2a7   :  { %v342_v5 = vpop.f32.mrf.mxu0 }
 0x2a8   :  { %v348_v6 = vmul.f32 %v342_v5, %v1409_v22  ;;  %v1157_v5 = vld [vmem:[%s1724_s4 + $0x60] sm:$0xff]  ;;  %s1268_s4 = smov 8  }
 0x2aa   :  { %v350_v9 = vadd.f32 %v348_v6, %v1416_v24 }
 0x2ac   :  { %v352_v10 = vsel %vm176_vm2, %v350_v9, -inf }
 0x2ad   :  { %353 = vmax.xlane.f32.xlu2 %v352_v10 }
 0x2af   :  { %v345_v11 = vpop.f32.mrf.mxu0 }
 0x2b0   :  { %v349_v12 = vmul.f32 %v345_v11, %v1424_v28 }
 0x2b2   :  { %v351_v13 = vadd.f32 %v349_v12, %v1431_v30 }
 0x2b4   :  { %v355_v14 = vsel %vm176_vm2, %v351_v13, -inf }
 0x2b5   :  { %356 = vmax.xlane.f32.xlu2 %v355_v14 }
 0x2b7   :  { %v485_v48 = vpop.f32.mrf.mxu0 }
 0x2bf   :  { %v488_v49 = vpop.f32.mrf.mxu0 }
 0x31b   :  { %v1534_v50 = vpop.f32.mrf.mxu3 }
 0x320   :  { %v354_v15 = vpop.xlane.xlu2 %353 }
 0x321   :  { %v358_v16 = vsub.f32 %v350_v9, %v354_v15 }
 0x323   :  { %v360_v17 = vmul.f32 1.442695, %v358_v16  ;;  %v1550_v55 = vpop.f32.mrf.mxu3 }
 0x325   :  { %1205 = vpow2.f32 %v360_v17 }
 0x328   :  { %v357_v18 = vpop.xlane.xlu2 %356 }
 0x329   :  { %v359_v19 = vsub.f32 %v351_v13, %v357_v18 }
 0x32b   :  { %v1206_v20 = vpop.eup %1205  ;;  %v362_v21 = vmul.f32 1.442695, %v359_v19 }
 0x32c   :  { %v364_v23 = vsel %vm176_vm2, %v1206_v20, 0.0 }
 0x32d   :  { %1207 = vpow2.f32 %v362_v21  ;;  %365 = vadd.xlane.f32.xlu0 %v364_v23  ;;  %v1153_v21 = vld [vmem:[%s1723_s3 + $0x70] sm:$0xff]  ;;  %v1152_v23 = vld [vmem:[%s1723_s3 + $0x68] sm:$0xff] }
 0x333   :  { %v1208_v25 = vpop.eup %1207 }
 0x334   :  { %v367_v26 = vsel %vm176_vm2, %v1208_v25, 0.0 }
 0x335   :  { %368 = vadd.xlane.f32.xlu1 %v367_v26  ;;  %v1148_v26 = vld [vmem:[%s1726_s6 + $0x10] sm:$0xff] }
 0x3a0   :  { %v366_v34 = vpop.xlane.xlu0 %365 }
 0x3a1   :  { %1209 = vrcp.f32 %v366_v34 }
 0x3a7   :  { %v1210_v38 = vpop.eup %1209 }
 0x3a8   :  { %v372_v39 = vmul.f32 %v1210_v38, %v1206_v20  ;;  %v369_v40 = vpop.xlane.xlu1 %368  ;;  %v1154_v20 = vld [vmem:[%s1723_s3 + $0x78] sm:$0xff] }
 0x3a9   :  { %1211 = vrcp.f32 %v369_v40 }
 0x3aa   :  { %1117 = vmatmul.msk.f32.vlgmr.msra.gmra.mxu1 %vm176_vm2, %v372_v39 }
 0x3ab   :  { %660 = vmatpush.msra.mxu1 %v1148_v26 }
 0x3af   :  { %v1212_v41 = vpop.eup %1211 }
 0x3b0   :  { %v373_v42 = vmul.f32 %v1212_v41, %v1208_v25  ;;  %v1151_v25 = vld [vmem:[%s1723_s3 + $0x60] sm:$0xff]  ;;  %v1166_v41 = vld [vmem:[%s1725_s5 + $0x78] sm:$0xff] }
 0x3b2   :  { %1118 = vmatmul.msk.f32.gmra.mxu1 %vm176_vm2, %v373_v42  ;;  %v1165_v42 = vld [vmem:[%s1725_s5 + $0x70] sm:$0xff] }
 0x3ba   :  { %1134 = vmatmul.msk.f32.vlgmr.msrb.gmra.mxu1 %vm52_vm0, %v1363_v8 }
 0x3c2   :  { %1135 = vmatmul.msk.f32.gmra.mxu1 %vm52_vm0, %v1358_v7 }
 0x427   :  { %v397_v44 = vpop.f32.mrf.mxu1 }
 0x428   :  { %1120 = vmatmul.msk.f32.vlgmr.msrb.gmra.mxu2 %vm136_vm1, %v397_v44 }
 0x429   :  { %687 = vmatpush.msrb.mxu2 %v1154_v20 }
 0x42b   :  { %688 = vmatpush.msrb.mxu2 %v1153_v21 }
 0x42d   :  { %689 = vmatpush.msrb.mxu2 %v1152_v23 }
 0x42f   :  { %v400_v45 = vpop.f32.mrf.mxu1  ;;  %690 = vmatpush.msrb.mxu2 %v1151_v25  ;;  %v1265_v25 = vmov 32.0  }
 0x430   :  { %1121 = vmatmul.msk.f32.gmra.mxu2 %vm136_vm1, %v400_v45  ;;  %v1164_v45 = vld [vmem:[%s1725_s5 + $0x68] sm:$0xff] }
 0x437   :  { %v513_v46 = vpop.f32.mrf.mxu1 }
 0x438   :  { %1140 = vmatmul.msk.f32.vlgmr.msra.gmra.mxu2 %vm52_vm0, %v1363_v8 }
 0x43f   :  { %v516_v47 = vpop.f32.mrf.mxu1 }
 0x440   :  { %1142 = vmatpush.xpose.msk.msra.mxu3 %vm136_vm1, %v516_v47  ;;  %1141 = vmatmul.msk.f32.gmra.mxu2 %vm52_vm0, %v1358_v7  ;;  %v1163_v47 = vld [vmem:[%s1725_s5 + $0x60] sm:$0xff] }
 0x444   :  { %1143 = vmatpush.xpose.msk.msra.mxu3 %vm136_vm1, %v513_v46 }
 0x447   :  { %1144 = vmatmul.msk.f32.vlgmr.msra.gmra.mxu3 %vm136_vm1, %v485_v48 }
 0x448   :  { %715 = vmatpush.msrb.mxu3 %v1160_v1  ;;  %1155 = vmatmul.msk.f32.vlgmr.msrb.gmra.mxu2 %vm52_vm0, %v1363_v8 }
 0x44a   :  { %716 = vmatpush.msrb.mxu3 %v1159_v2 }
 0x44c   :  { %717 = vmatpush.msrb.mxu3 %v1158_v3  ;;  %v1175_v3 = vld [vmem:[%s1726_s6 + $0x18] sm:$0xff] }
 0x44e   :  { %718 = vmatpush.msrb.mxu3 %v1157_v5 }
 0x44f   :  { %1145 = vmatmul.msk.f32.gmra.mxu3 %vm136_vm1, %v488_v49 }
 0x450   :  { %1156 = vmatmul.msk.f32.gmra.mxu2 %vm52_vm0, %v1358_v7  ;;  %867 = vmatpush.msra.mxu3 %v1175_v3 }
 0x457   :  { %1161 = vmatmul.msk.f32.vlgmr.msrb.gmra.mxu3 %vm52_vm0, %v1363_v8 }
 0x45f   :  { %1162 = vmatmul.msk.f32.gmra.mxu3 %vm52_vm0, %v1358_v7 }
 0x4ab   :  { %v1560_v0 = vpop.f32.mrf.mxu2 }
 0x4ac   :  { %v458_v43 = vadd.f32 %v1534_v50, %v1560_v0 }
 0x4b3   :  { %v1571_v4 = vpop.f32.mrf.mxu2 }
 0x4b4   :  { %v461_v48 = vadd.f32 %v1550_v55, %v1571_v4 }
 0x4bb   :  { %v541_v9 = vpop.f32.mrf.mxu2 }
 0x4c3   :  { %v544_v13 = vpop.f32.mrf.mxu2 }
 0x4c4   :  { %628 = vmatpush.msra.mxu0 %v544_v13 }
 0x4c6   :  { %629 = vmatpush.msra.mxu0 %v541_v9 }
 0x4c8   :  { %743 = vmatpush.msrb.mxu0 %v1166_v41 }
 0x4ca   :  { %v576_v56 = vpop.f32.mrf.mxu3  ;;  %744 = vmatpush.msrb.mxu0 %v1165_v42 }
 0x4cb   :  { %v582_v57 = vmul.f32 %v576_v56, %v1409_v22  ;;  %v692_v39 = vpop.f32.mrf.mxu2 }
 0x4cc   :  { %745 = vmatpush.msrb.mxu0 %v1164_v45  ;;  %v938_v45 = vld [vmem:[%s1728_s8 + $0x10] sm:$0xff] }
 0x4cd   :  { %v584_v58 = vadd.f32 %v582_v57, %v1416_v24 }
 0x4ce   :  { %746 = vmatpush.msrb.mxu0 %v1163_v47  ;;  %v936_v47 = vld [vmem:[%s1728_s8] sm:$0xff] }
 0x4cf   :  { %v586_v59 = vsel %vm176_vm2, %v584_v58, -inf }
 0x4d0   :  { %587 = vmax.xlane.f32.xlu2 %v586_v59 }
 0x4d2   :  { %v579_v60 = vpop.f32.mrf.mxu3 }
 0x4d3   :  { %v583_v61 = vmul.f32 %v579_v60, %v1424_v28  ;;  %v695_v40 = vpop.f32.mrf.mxu2 }
 0x4d5   :  { %v585_v62 = vadd.f32 %v583_v61, %v1431_v30 }
 0x4d7   :  { %v589_v63 = vsel %vm176_vm2, %v585_v62, -inf }
 0x4d8   :  { %590 = vmax.xlane.f32.xlu0 %v589_v63 }
 0x4da   :  { %v720_v29 = vpop.f32.mrf.mxu3 }
 0x4e2   :  { %v723_v34 = vpop.f32.mrf.mxu3 }
 0x4e3   :  { %1169 = vmatpush.xpose.msk.msrb.mxu1 %vm136_vm1, %v723_v34 }
 0x4e7   :  { %1170 = vmatpush.xpose.msk.msrb.mxu1 %vm136_vm1, %v720_v29 }
 0x543   :  { %v588_v6 = vpop.xlane.xlu2 %587 }
 0x544   :  { %v592_v10 = vsub.f32 %v584_v58, %v588_v6 }
 0x546   :  { %v594_v11 = vmul.f32 1.442695, %v592_v10 }
 0x548   :  { %1213 = vpow2.f32 %v594_v11 }
 0x54b   :  { %v591_v12 = vpop.xlane.xlu0 %590 }
 0x54c   :  { %v593_v14 = vsub.f32 %v585_v62, %v591_v12 }
 0x54e   :  { %v1214_v15 = vpop.eup %1213  ;;  %v596_v16 = vmul.f32 1.442695, %v593_v14  ;;  %v1194_v14 = vld [vmem:[%s1727_s7] ss:$0 sm:$0xff] }
 0x54f   :  { %v598_v17 = vsel %vm176_vm2, %v1214_v15, 0.0 }
 0x550   :  { %1215 = vpow2.f32 %v596_v16  ;;  %599 = vadd.xlane.f32.xlu1 %v598_v17 }
 0x556   :  { %v1216_v18 = vpop.eup %1215 }
 0x557   :  { %v601_v19 = vsel %vm176_vm2, %v1216_v18, 0.0 }
 0x558   :  { %602 = vadd.xlane.f32.xlu2 %v601_v19 }
 0x5c3   :  { %v600_v27 = vpop.xlane.xlu1 %599 }
 0x5c4   :  { %1217 = vrcp.f32 %v600_v27 }
 0x5ca   :  { %v1218_v31 = vpop.eup %1217 }
 0x5cb   :  { %v606_v32 = vmul.f32 %v1218_v31, %v1214_v15  ;;  %v603_v33 = vpop.xlane.xlu2 %602 }
 0x5cc   :  { %1219 = vrcp.f32 %v603_v33 }
 0x5cd   :  { %1146 = vmatmul.msk.f32.vlgmr.msra.gmra.mxu0 %vm176_vm2, %v606_v32 }
 0x5d2   :  { %v1220_v35 = vpop.eup %1219 }
 0x5d3   :  { %v607_v36 = vmul.f32 %v1220_v35, %v1216_v18 }
 0x5d5   :  { %1147 = vmatmul.msk.f32.gmra.mxu0 %vm176_vm2, %v607_v36 }
 0x5dd   :  { %1167 = vmatmul.msk.f32.vlgmr.msrb.gmra.mxu0 %vm52_vm0, %v1363_v8 }
 0x5e5   :  { %1168 = vmatmul.msk.f32.gmra.mxu0 %vm52_vm0, %v1358_v7 }
 0x64a   :  { %v631_v37 = vpop.f32.mrf.mxu0 }
 0x64b   :  { %1149 = vmatmul.msk.f32.vlgmr.msra.gmra.mxu1 %vm136_vm1, %v631_v37 }
 0x652   :  { %v634_v38 = vpop.f32.mrf.mxu0 }
 0x653   :  { %1150 = vmatmul.msk.f32.gmra.mxu1 %vm136_vm1, %v634_v38 }
 0x65a   :  { %v748_v59 = vpop.f32.mrf.mxu0 }
 0x65b   :  { %1171 = vmatmul.msk.f32.vlgmr.msrb.gmra.mxu1 %vm136_vm1, %v692_v39 }
 0x662   :  { %v751_v62 = vpop.f32.mrf.mxu0 }
 0x663   :  { %1172 = vmatmul.msk.f32.gmra.mxu1 %vm136_vm1, %v695_v40  ;;  %835 = vmatpush.msra.mxu2 %v751_v62 }
 0x665   :  { %836 = vmatpush.msra.mxu2 %v748_v59 }
 0x6c8   :  { %v662_v44 = vpop.f32.mrf.mxu1 }
 0x6c9   :  { %v668_v46 = vadd.f32 %v662_v44, %v458_v43  ;;  %v939_v44 = vld [vmem:[%s1728_s8 + $0x18] sm:$0xff] }
 0x6ca   :  { %962 = vmatpush.msra.mxu0 %v939_v44 }
 0x6cc   :  { %963 = vmatpush.msra.mxu0 %v938_v45 }
 0x6d0   :  { %v665_v49 = vpop.f32.mrf.mxu1 }
 0x6d1   :  { %v669_v50 = vadd.f32 %v665_v49, %v461_v48 }
 0x6d8   :  { %v783_v51 = vpop.f32.mrf.mxu1 }
 0x6d9   :  { %v789_v52 = vmul.f32 %v783_v51, %v1409_v22  ;;  %v982_v51 = vld [vmem:[%s1730_s10 + $0x38] sm:$0xff] }
 0x6da   :  { %1002 = vmatpush.msra.mxu1 %v982_v51 }
 0x6db   :  { %v791_v53 = vadd.f32 %v789_v52, %v1416_v24  ;;  %v981_v52 = vld [vmem:[%s1730_s10 + $0x30] sm:$0xff] }
 0x6dc   :  { %1003 = vmatpush.msra.mxu1 %v981_v52 }
 0x6dd   :  { %v793_v54 = vsel %vm176_vm2, %v791_v53, -inf }
 0x6de   :  { %794 = vmax.xlane.f32.xlu0 %v793_v54  ;;  %v979_v54 = vld [vmem:[%s1730_s10 + $0x20] sm:$0xff] }
 0x6e0   :  { %v786_v56 = vpop.f32.mrf.mxu1 }
 0x6e1   :  { %v790_v57 = vmul.f32 %v786_v56, %v1424_v28 }
 0x6e3   :  { %v792_v58 = vadd.f32 %v790_v57, %v1431_v30 }
 0x6e5   :  { %v796_v55 = vsel %vm176_vm2, %v792_v58, -inf }
 0x6e6   :  { %797 = vmax.xlane.f32.xlu1 %v796_v55 }
 0x751   :  { %v795_v60 = vpop.xlane.xlu0 %794 }
 0x752   :  { %v799_v61 = vsub.f32 %v791_v53, %v795_v60  ;;  %v980_v53 = vld [vmem:[%s1730_s10 + $0x28] sm:$0xff] }
 0x753   :  { %1004 = vmatpush.msra.mxu1 %v980_v53 }
 0x754   :  { %v801_v63 = vmul.f32 1.442695, %v799_v61 }
 0x755   :  { %1005 = vmatpush.msra.mxu1 %v979_v54 }
 0x756   :  { %1221 = vpow2.f32 %v801_v63 }
 0x759   :  { %v798_v22 = vpop.xlane.xlu1 %797 }
 0x75a   :  { %v800_v24 = vsub.f32 %v792_v58, %v798_v22  ;;  %v978_v58 = vld [vmem:[%s1730_s10 + $0x18] sm:$0xff] }
 0x75b   :  { %1006 = vmatpush.msra.mxu1 %v978_v58 }
 0x75c   :  { %v1222_v0 = vpop.eup %1221  ;;  %v803_v1 = vmul.f32 1.442695, %v800_v24 }
 0x75d   :  { %v805_v2 = vsel %vm176_vm2, %v1222_v0, 0.0 }
 0x75e   :  { %1223 = vpow2.f32 %v803_v1  ;;  %806 = vadd.xlane.f32.xlu2 %v805_v2 }
 0x764   :  { %v1224_v28 = vpop.eup %1223 }
 0x765   :  { %v808_v30 = vsel %vm176_vm2, %v1224_v28, 0.0 }
 0x766   :  { %809 = vadd.xlane.f32.xlu0 %v808_v30 }
 0x7d1   :  { %v807_v4 = vpop.xlane.xlu2 %806 }
 0x7d2   :  { %1225 = vrcp.f32 %v807_v4 }
 0x7d8   :  { %v1226_v5 = vpop.eup %1225 }
 0x7d9   :  { %v813_v6 = vmul.f32 %v1226_v5, %v1222_v0  ;;  %v810_v9 = vpop.xlane.xlu0 %809 }
 0x7da   :  { %1227 = vrcp.f32 %v810_v9 }
 0x7db   :  { %1173 = vmatmul.msk.f32.vlgmr.msra.gmra.mxu2 %vm176_vm2, %v813_v6  ;;  %1229 = vrcp.f32 %v1265_v25 }
 0x7e0   :  { %v1228_v10 = vpop.eup %1227 }
 0x7e1   :  { %v814_v11 = vmul.f32 %v1228_v10, %v1224_v28  ;;  %v1230_v26 = vpop.eup %1229 }
 0x7e2   :  { %v890_v27 = vmul.f32 32.0, %v1230_v26  ;;  %vm894_vm3 = vweird.f32 %v1230_v26 }
 0x7e3   :  { %1174 = vmatmul.msk.f32.gmra.mxu2 %vm176_vm2, %v814_v11  ;;  %v976_v11 = vld [vmem:[%s1730_s10 + $0x8] sm:$0xff] }
 0x7e4   :  { %v891_v29 = vsub.f32 1.0, %v890_v27 }
 0x7e6   :  { %v892_v31 = vmul.f32 %v1230_v26, %v891_v29 }
 0x7e8   :  { %v893_v32 = vadd.f32 %v1230_v26, %v892_v31 }
 0x7ea   :  { %v1649_v33 = vsel %vm894_vm3, %v1230_v26, %v893_v32 }
 0x85e   :  { %v838_v12 = vpop.f32.mrf.mxu2 }
 0x85f   :  { %1176 = vmatmul.msk.f32.vlgmr.msra.gmra.mxu3 %vm136_vm1, %v838_v12  ;;  %v975_v12 = vld [vmem:[%s1730_s10] sm:$0xff] }
 0x866   :  { %v841_v13 = vpop.f32.mrf.mxu2 }
 0x867   :  { %1177 = vmatmul.msk.f32.gmra.mxu3 %vm136_vm1, %v841_v13 }
 0x8e2   :  { %v869_v15 = vpop.f32.mrf.mxu3 }
 0x8e3   :  { %v875_v16 = vadd.f32 %v869_v15, %v668_v46  ;;  %v937_v46 = vld [vmem:[%s1728_s8 + $0x8] sm:$0xff] }
 0x8e4   :  { %964 = vmatpush.msra.mxu0 %v937_v46 }
 0x8e5   :  { %v881_v17 = vadd.f32 %v1194_v14, %v875_v16 }
 0x8e6   :  { %965 = vmatpush.msra.mxu0 %v936_v47 }
 0x8e7   :  { %v883_v18 = vsel %vm52_vm0, %v881_v17, 0.0 }
 0x8e8   :  { %884 = vadd.xlane.f32.xlu1 %v883_v18 }
 0x8ea   :  { %v872_v19 = vpop.f32.mrf.mxu3 }
 0x8eb   :  { %v876_v20 = vadd.f32 %v872_v19, %v669_v50  ;;  %v1196_v19 = vld [vmem:[%s1731_s11] ss:$0 sm:$0xff] }
 0x8ed   :  { %v882_v21 = vadd.f32 %v1194_v14, %v876_v20 }
 0x8ef   :  { %v886_v23 = vsel %vm52_vm0, %v882_v21, 0.0 }
 0x8f0   :  { %887 = vadd.xlane.f32.xlu2 %v886_v23 }
 0x95b   :  { %v885_v34 = vpop.xlane.xlu1 %884 }
 0x95c   :  { %v896_v35 = vmul.f32 %v1649_v33, %v885_v34 }
 0x95e   :  { %v898_v36 = vsub.f32 %v881_v17, %v896_v35 }
 0x960   :  { %v900_v37 = vmul.f32 %v898_v36, %v898_v36 }
 0x962   :  { %v902_v38 = vsel %vm52_vm0, %v900_v37, 0.0 }
 0x963   :  { %903 = vadd.xlane.f32.xlu0 %v902_v38  ;;  %v888_v39 = vpop.xlane.xlu2 %887 }
 0x964   :  { %v897_v40 = vmul.f32 %v1649_v33, %v888_v39 }
 0x966   :  { %v899_v41 = vsub.f32 %v882_v21, %v897_v40 }
 0x968   :  { %v901_v42 = vmul.f32 %v899_v41, %v899_v41 }
 0x96a   :  { %v905_v43 = vsel %vm52_vm0, %v901_v42, 0.0 }
 0x96b   :  { %906 = vadd.xlane.f32.xlu1 %v905_v43 }
 0x9d6   :  { %v904_v48 = vpop.xlane.xlu0 %903 }
 0x9d7   :  { %v908_v49 = vmul.f32 0.032258064, %v904_v48 }
 0x9d9   :  { %v910_v50 = vadd.f32 1e-06, %v908_v49 }
 0x9db   :  { %1231 = vrsqrt.f32 %v910_v50  ;;  %vm918_vm5 = vweird.f32 %v910_v50 }
 0x9de   :  { %v907_v56 = vpop.xlane.xlu1 %906 }
 0x9df   :  { %v909_v57 = vmul.f32 0.032258064, %v907_v56 }
 0x9e1   :  { %v1232_v55 = vpop.eup %1231  ;;  %v911_v59 = vadd.f32 1e-06, %v909_v57 }
 0x9e2   :  { %v913_v60 = vmul.f32 %v1232_v55, %v910_v50  ;;  %vm919_vm4 = vweird.f32 %v1232_v55 }
 0x9e3   :  { %1233 = vrsqrt.f32 %v911_v59  ;;  %vm920_vm6 = vmor %vm918_vm5, %vm919_vm4  ;;  %vm928_vm8 = vweird.f32 %v911_v59 }
 0x9e4   :  { %v914_v61 = vmul.f32 %v1232_v55, %v913_v60 }
 0x9e6   :  { %v915_v62 = vmul.f32 0.5, %v914_v61 }
 0x9e8   :  { %v916_v63 = vsub.f32 1.5, %v915_v62 }
 0x9e9   :  { %v1234_v22 = vpop.eup %1233 }
 0x9ea   :  { %v917_v24 = vmul.f32 %v1232_v55, %v916_v63  ;;  %v923_v0 = vmul.f32 %v1234_v22, %v911_v59  ;;  %vm929_vm7 = vweird.f32 %v1234_v22 }
 0x9eb   :  { %vm930_vm9 = vmor %vm928_vm8, %vm929_vm7 }
 0x9ec   :  { %v921_v1 = vsel %vm920_vm6, %v1232_v55, %v917_v24  ;;  %v924_v2 = vmul.f32 %v1234_v22, %v923_v0 }
 0x9ed   :  { %v932_v28 = vmul.f32 %v921_v1, %v898_v36 }
 0x9ee   :  { %v925_v30 = vmul.f32 0.5, %v924_v2 }
 0x9ef   :  { %v1683_v3 = vadd.f32 %v932_v28, %v1363_v8  ;;  %v977_v8 = vld [vmem:[%s1730_s10 + $0x10] sm:$0xff] }
 0x9f0   :  { %v926_v4 = vsub.f32 1.5, %v925_v30  ;;  %1007 = vmatpush.msra.mxu1 %v977_v8 }
 0x9f1   :  { %1178 = vmatmul.msk.f32.vlgmr.msra.gmra.mxu0 %vm52_vm0, %v1683_v3 }
 0x9f2   :  { %v927_v5 = vmul.f32 %v1234_v22, %v926_v4  ;;  %1008 = vmatpush.msra.mxu1 %v976_v11 }
 0x9f4   :  { %v931_v6 = vsel %vm930_vm9, %v1234_v22, %v927_v5  ;;  %1009 = vmatpush.msra.mxu1 %v975_v12 }
 0x9f5   :  { %v933_v9 = vmul.f32 %v931_v6, %v899_v41 }
 0x9f7   :  { %v1688_v10 = vadd.f32 %v933_v9, %v1358_v7  ;;  %v1195_v7 = vld [vmem:[%s1729_s9] ss:$0 sm:$0xff]  ;;  %s1266_s9 = smov [#allocation2]  }
 0x9f8   :  { %s1069_s10 = sshll.u32 %s1266_s9, 4  ;;  %s1070_s10 = int_to_ptr.vmem [resolvable:$true] %s1069_s10 }
 0x9f9   :  { %1179 = vmatmul.msk.f32.gmra.mxu0 %vm52_vm0, %v1688_v10 }
 0xa6e   :  { %v967_v13 = vpop.f32.mrf.mxu0 }
 0xa6f   :  { %v968_v14 = vadd.f32 %v1195_v7, %v967_v13 }
 0xa71   :  { %v973_v15 = vmax.f32 %v968_v14, 0.0 }
 0xa73   :  { %1180 = vmatmul.msk.f32.vlgmr.msra.gmra.mxu1 %vm987_vm10, %v973_v15 }
 0xa76   :  { %v970_v16 = vpop.f32.mrf.mxu0 }
 0xa77   :  { %v971_v17 = vadd.f32 %v1195_v7, %v970_v16 }
 0xa79   :  { %v974_v18 = vmax.f32 %v971_v17, 0.0 }
 0xa7b   :  { %1181 = vmatmul.msk.f32.gmra.mxu1 %vm987_vm10, %v974_v18 }
 0xaf0   :  { %v1011_v20 = vpop.f32.mrf.mxu1 }
 0xaf1   :  { %v1012_v21 = vadd.f32 %v1196_v19, %v1011_v20 }
 0xaf3   :  { %v1017_v23 = vsel %vm52_vm0, %v1012_v21, 0.0 }
 0xaf4   :  { %1018 = vadd.xlane.f32.xlu2 %v1017_v23 }
 0xaf8   :  { %v1014_v25 = vpop.f32.mrf.mxu1 }
 0xaf9   :  { %v1015_v26 = vadd.f32 %v1196_v19, %v1014_v25 }
 0xafb   :  { %v1020_v27 = vsel %vm52_vm0, %v1015_v26, 0.0 }
 0xafc   :  { %1021 = vadd.xlane.f32.xlu0 %v1020_v27 }
 0xb67   :  { %v1019_v29 = vpop.xlane.xlu2 %1018 }
 0xb68   :  { %v1023_v31 = vmul.f32 %v1019_v29, %v1649_v33 }
 0xb6a   :  { %v1025_v32 = vsub.f32 %v1012_v21, %v1023_v31 }
 0xb6c   :  { %v1027_v34 = vmul.f32 %v1025_v32, %v1025_v32 }
 0xb6e   :  { %v1029_v35 = vsel %vm52_vm0, %v1027_v34, 0.0 }
 0xb6f   :  { %v1022_v36 = vpop.xlane.xlu0 %1021  ;;  %1030 = vadd.xlane.f32.xlu1 %v1029_v35 }
 0xb70   :  { %v1024_v37 = vmul.f32 %v1022_v36, %v1649_v33 }
 0xb72   :  { %v1026_v38 = vsub.f32 %v1015_v26, %v1024_v37 }
 0xb74   :  { %v1028_v39 = vmul.f32 %v1026_v38, %v1026_v38 }
 0xb76   :  { %v1032_v40 = vsel %vm52_vm0, %v1028_v39, 0.0 }
 0xb77   :  { %1033 = vadd.xlane.f32.xlu2 %v1032_v40 }
 0xbe2   :  { %v1031_v41 = vpop.xlane.xlu1 %1030 }
 0xbe3   :  { %v1035_v42 = vmul.f32 0.032258064, %v1031_v41 }
 0xbe5   :  { %v1037_v43 = vadd.f32 1e-06, %v1035_v42 }
 0xbe7   :  { %1235 = vrsqrt.f32 %v1037_v43  ;;  %vm1045_vm12 = vweird.f32 %v1037_v43 }
 0xbea   :  { %v1034_v44 = vpop.xlane.xlu2 %1033 }
 0xbeb   :  { %v1036_v45 = vmul.f32 0.032258064, %v1034_v44 }
 0xbed   :  { %v1236_v46 = vpop.eup %1235  ;;  %v1038_v47 = vadd.f32 1e-06, %v1036_v45 }
 0xbee   :  { %v1040_v48 = vmul.f32 %v1236_v46, %v1037_v43  ;;  %vm1046_vm11 = vweird.f32 %v1236_v46 }
 0xbef   :  { %1237 = vrsqrt.f32 %v1038_v47  ;;  %vm1047_vm13 = vmor %vm1045_vm12, %vm1046_vm11  ;;  %vm1055_vm15 = vweird.f32 %v1038_v47 }
 0xbf0   :  { %v1041_v49 = vmul.f32 %v1236_v46, %v1040_v48 }
 0xbf2   :  { %v1042_v50 = vmul.f32 0.5, %v1041_v49 }
 0xbf4   :  { %v1043_v51 = vsub.f32 1.5, %v1042_v50 }
 0xbf5   :  { %v1238_v33 = vpop.eup %1237 }
 0xbf6   :  { %v1044_v52 = vmul.f32 %v1236_v46, %v1043_v51  ;;  %v1050_v53 = vmul.f32 %v1238_v33, %v1038_v47  ;;  %vm1056_vm14 = vweird.f32 %v1238_v33 }
 0xbf7   :  { %vm1057_vm1 = vmor %vm1055_vm15, %vm1056_vm14 }
 0xbf8   :  { %v1048_v54 = vsel %vm1047_vm13, %v1236_v46, %v1044_v52  ;;  %v1051_v56 = vmul.f32 %v1238_v33, %v1050_v53 }
 0xbf9   :  { %v1059_v57 = vmul.f32 %v1048_v54, %v1025_v32 }
 0xbfa   :  { %v1052_v58 = vmul.f32 0.5, %v1051_v56 }
 0xbfb   :  { %v1061_v55 = vadd.f32 %v1059_v57, %v1683_v3 }
 0xbfc   :  { %v1053_v59 = vsub.f32 1.5, %v1052_v58 }
 0xbfd   :  { %1063 = vst.msk [vmem:[#allocation2] sm:$0xff] %vm52_vm0, %v1061_v55 }
 0xbfe   :  { %v1054_v60 = vmul.f32 %v1238_v33, %v1053_v59 }
 0xc00   :  { %v1058_v61 = vsel %vm1057_vm1, %v1238_v33, %v1054_v60 }
 0xc01   :  { %v1060_v62 = vmul.f32 %v1058_v61, %v1026_v38 }
 0xc03   :  { %v1062_v63 = vadd.f32 %v1060_v62, %v1688_v10 }
 0xc05   :  { %1064 = vst.msk [vmem:[#allocation2 + $0x8] sm:$0xff] %vm52_vm0, %v1062_v63 }
 0xc06   :  { %1077 = dma.vmem_to_hbm [thread:$0]  %s1070_s10, 256, %s1072_s15, [#allocation3], %s1267_s16, %s1267_s16, %s1268_s4  }
 0xc07   :  { %1263 = dma.done.wait [#allocation3], 256  }
 0xc08   :  { %1264 = vsyncadd [#allocation3], 4294967040 }
 0xc09   :  { %1082 = vsyncpa [#allocation3], 1 }

</bundles_post_ra>
